<compile_context>
chip_gen: v6e
topology: v6e:2x2x1
jax: 0.10.0
libtpu: 0.0.40
codegen_flags: <defaults>
</compile_context>

<pallas_src>
import jax
import jax.numpy as jnp
from jax import lax
from jax.experimental import pallas as pl
from jax.experimental.pallas import tpu as pltpu


def _make_sobel_kernel(H: int, W: int):
    """Kernel over a (rows, H*W) tile: one flattened image per sublane row."""
    HW = H * W

    def kernel(x_ref, col_ref, o_ref):
        x = x_ref[...].astype(jnp.float32)          # (rows, HW)

        # Boundary masks -- hoisted, computed once per grid step.
        # k: flat pixel index (lane iota); j: column index (tiny aux input,
        # avoids an in-kernel integer mod).
        k = lax.broadcasted_iota(jnp.int32, (1, HW), 1)
        j = col_ref[...]                            # (1, HW) int32
        not_first_col = j > 0                       # j-1 neighbour exists
        not_last_col = j < (W - 1)                  # j+1 neighbour exists
        not_first_row = k >= W                      # i-1 neighbour exists
        not_last_row = k < (H - 1) * W              # i+1 neighbour exists

        def nbr(v, d, valid):
            # Value of the spatial neighbour at flat offset +d (zero padding
            # outside the image).  Cyclic roll; the wrapped lanes are exactly
            # the masked ones.
            y = pltpu.roll(v, shift=(HW - d) % HW, axis=1)
            return jnp.where(valid, y, 0.0)

        # Separable Sobel (nn.Conv2d == cross-correlation), zero padding:
        #   s[i,j] = x[i-1,j] + 2 x[i,j] + x[i+1,j];  dx = s[i,j+1] - s[i,j-1]
        #   t[i,j] = x[i,j-1] + 2 x[i,j] + x[i,j+1];  dy = t[i+1,j] - t[i-1,j]
        x2 = x + x
        s = nbr(x, -W, not_first_row) + x2 + nbr(x, W, not_last_row)
        dx = nbr(s, 1, not_last_col) - nbr(s, -1, not_first_col)
        t = nbr(x, -1, not_first_col) + x2 + nbr(x, 1, not_last_col)
        dy = nbr(t, W, not_last_row) - nbr(t, -W, not_first_row)

        o_ref[...] = jnp.sqrt(dx * dx + dy * dy).astype(o_ref.dtype)

    return kernel


def _pick_block_rows(n_rows: int, hw: int) -> int:
    """Images (rows) per grid block for the (N, H*W) layout.

    ~1 MiB of f32 per block keeps ~6 live f32 temporaries + double-buffered
    in/out pipeline blocks well under the 32 MiB scoped VMEM limit on all
    generations (v7x is the tightest).  Shrink -- but not below ~512 KiB --
    only to give the pipeline >= 8 grid steps (>= 4 per TC after megacore).
    """
    row_bytes_f32 = hw * 4
    rows_hi = max(1, (1 << 20) // row_bytes_f32)    # ~1 MiB f32 block target
    rows_lo = max(1, (1 << 19) // row_bytes_f32)    # ~512 KiB per-buffer floor

    rows = rows_hi
    if n_rows // rows < 8:                          # too few pipeline steps
        rows = max(rows_lo, n_rows // 8, 1)
    if rows < n_rows:
        # Multi-block grid: keep the sublane (second-to-last) dim a multiple
        # of 8 to satisfy the (8, 128) block rule and keep sublanes dense.
        rows = max(8, rows - rows % 8)
    return int(min(rows, n_rows))


@jax.jit
def gradient_smooth(img: jax.Array) -> jax.Array:
    """img: (B, C, H, W) -> (B, C, H, W) Sobel gradient magnitude."""
    B, C, H, W = img.shape
    N, HW = B * C, H * W

    x = img.reshape(N, HW)                  # metadata-only row-major reshape
    # Column index per flat pixel (tiny constant aux input; computed by XLA).
    col = (jnp.arange(HW, dtype=jnp.int32) % W).reshape(1, HW)

    rows = _pick_block_rows(N, HW)
    grid_n = pl.cdiv(N, rows)
    # TODO(synk): single images whose f32 working set (~6 * H*W * 4 bytes)
    # exceeds the VMEM budget (e.g. >= 512x512 on v7x) need 2-D tiling over
    # (N, H) with a 1-row halo; not required for the shapes exercised here.

    itemsize = jnp.dtype(img.dtype).itemsize
    cost = pl.CostEstimate(
        flops=20 * N * HW,                      # adds/subs/selects per pixel
        transcendentals=N * HW,                 # one sqrt per pixel
        bytes_accessed=2 * N * HW * itemsize + HW * 4,
    )

    out = pl.pallas_call(
        _make_sobel_kernel(H, W),
        out_shape=jax.ShapeDtypeStruct((N, HW), img.dtype),
        grid_spec=pltpu.PrefetchScalarGridSpec(
            num_scalar_prefetch=0,
            grid=(grid_n,),
            in_specs=[
                pl.BlockSpec((rows, HW), lambda n: (n, 0)),
                pl.BlockSpec((1, HW), lambda n: (0, 0)),   # same block every step
            ],
            out_specs=pl.BlockSpec((rows, HW), lambda n: (n, 0)),
        ),
        compiler_params=pltpu.CompilerParams(
            dimension_semantics=("parallel",),
            vmem_limit_bytes=32 * 1024 * 1024,
        ),
        cost_estimate=cost,
    )(x, col)

    return out.reshape(B, C, H, W)


def _reference(img: jax.Array) -> jax.Array:
    """Pure-JAX reference (same math, no Pallas) for a correctness check."""
    B, C, H, W = img.shape
    x = img.reshape(B * C, H, W).astype(jnp.float32)
    p = jnp.pad(x, ((0, 0), (1, 1), (1, 1)))
    tl = p[:, 0:H, 0:W]
    tc = p[:, 0:H, 1:W + 1]
    tr = p[:, 0:H, 2:W + 2]
    ml = p[:, 1:H + 1, 0:W]
    mr = p[:, 1:H + 1, 2:W + 2]
    bl = p[:, 2:H + 2, 0:W]
    bc = p[:, 2:H + 2, 1:W + 1]
    br = p[:, 2:H + 2, 2:W + 2]
    dx = (tr - tl) + 2.0 * (mr - ml) + (br - bl)
    dy = (bl - tl) + 2.0 * (bc - tc) + (br - tr)
    return jnp.sqrt(dx * dx + dy * dy).astype(img.dtype).reshape(B, C, H, W)


if __name__ == "__main__":
    key = jax.random.PRNGKey(0)
    B, C, H, W = 2, 4, 16, 16
    img = jax.random.normal(key, (B, C, H, W), dtype=jnp.float32)

    out = jax.block_until_ready(gradient_smooth(img))
    ref = _reference(img)

    assert out.shape == (B, C, H, W)
    assert out.dtype == img.dtype
    assert jnp.allclose(out, ref, atol=1e-4, rtol=1e-4)

    print("KERNEL_OK")
</pallas_src>

<mosaic_0001>
module attributes {stable_mosaic.version = 11 : i64} {
  func.func @kernel(%arg0: i32, %arg1: memref<8x256xf32, #tpu.memory_space<vmem>>, %arg2: memref<1x256xi32, #tpu.memory_space<vmem>>, %arg3: memref<8x256xf32, #tpu.memory_space<vmem>>) attributes {dimension_semantics = [#tpu.dimension_semantics<parallel>], iteration_bounds = array<i64: 1>, scalar_prefetch = 0 : i64, scratch_operands = 0 : i64, tpu.core_type = #tpu.core_type<tc>, window_params = [{transform_indices = @transform_0, window_bounds = array<i64: 8, 256>}, {pipeline_mode = #tpu.pipeline_mode<synchronous>, transform_indices = @transform_1, window_bounds = array<i64: 1, 256>}, {transform_indices = @transform_2, window_bounds = array<i64: 8, 256>}]} {
    %c0 = arith.constant 0 : index
    %c0_0 = arith.constant 0 : index
    %0 = vector.load %arg1[%c0, %c0_0] : memref<8x256xf32, #tpu.memory_space<vmem>>, vector<8x256xf32>
    %1 = tpu.iota {dimensions = array<i32: 1>} : vector<1x256xi32>
    %c0_1 = arith.constant 0 : index
    %c0_2 = arith.constant 0 : index
    %2 = vector.load %arg2[%c0_1, %c0_2] : memref<1x256xi32, #tpu.memory_space<vmem>>, vector<1x256xi32>
    %c0_i32 = arith.constant 0 : i32
    %3 = vector.broadcast %c0_i32 : i32 to vector<1x256xi32>
    %4 = arith.cmpi sgt, %2, %3 : vector<1x256xi32>
    %c15_i32 = arith.constant 15 : i32
    %5 = vector.broadcast %c15_i32 : i32 to vector<1x256xi32>
    %6 = arith.cmpi slt, %2, %5 : vector<1x256xi32>
    %c16_i32 = arith.constant 16 : i32
    %7 = vector.broadcast %c16_i32 : i32 to vector<1x256xi32>
    %8 = arith.cmpi sge, %1, %7 : vector<1x256xi32>
    %c240_i32 = arith.constant 240 : i32
    %9 = vector.broadcast %c240_i32 : i32 to vector<1x256xi32>
    %10 = arith.cmpi slt, %1, %9 : vector<1x256xi32>
    %11 = arith.addf %0, %0 : vector<8x256xf32>
    %c16_i32_3 = arith.constant 16 : i32
    %12 = tpu.dynamic_rotate %0 by %c16_i32_3 dim 1 : vector<8x256xf32>, i32 -> vector<8x256xf32>
    %cst = arith.constant 0.000000e+00 : f32
    %13 = vector.shape_cast %8 : vector<1x256xi1> to vector<1x256xi1>
    %14 = vector.broadcast %13 : vector<1x256xi1> to vector<8x256xi1>
    %15 = vector.broadcast %cst : f32 to vector<8x256xf32>
    %16 = arith.select %14, %12, %15 : vector<8x256xi1>, vector<8x256xf32>
    %17 = arith.addf %16, %11 : vector<8x256xf32>
    %c240_i32_4 = arith.constant 240 : i32
    %18 = tpu.dynamic_rotate %0 by %c240_i32_4 dim 1 : vector<8x256xf32>, i32 -> vector<8x256xf32>
    %cst_5 = arith.constant 0.000000e+00 : f32
    %19 = vector.shape_cast %10 : vector<1x256xi1> to vector<1x256xi1>
    %20 = vector.broadcast %19 : vector<1x256xi1> to vector<8x256xi1>
    %21 = vector.broadcast %cst_5 : f32 to vector<8x256xf32>
    %22 = arith.select %20, %18, %21 : vector<8x256xi1>, vector<8x256xf32>
    %23 = arith.addf %17, %22 : vector<8x256xf32>
    %c255_i32 = arith.constant 255 : i32
    %24 = tpu.dynamic_rotate %23 by %c255_i32 dim 1 : vector<8x256xf32>, i32 -> vector<8x256xf32>
    %cst_6 = arith.constant 0.000000e+00 : f32
    %25 = vector.shape_cast %6 : vector<1x256xi1> to vector<1x256xi1>
    %26 = vector.broadcast %25 : vector<1x256xi1> to vector<8x256xi1>
    %27 = vector.broadcast %cst_6 : f32 to vector<8x256xf32>
    %28 = arith.select %26, %24, %27 : vector<8x256xi1>, vector<8x256xf32>
    %c1_i32 = arith.constant 1 : i32
    %29 = tpu.dynamic_rotate %23 by %c1_i32 dim 1 : vector<8x256xf32>, i32 -> vector<8x256xf32>
    %cst_7 = arith.constant 0.000000e+00 : f32
    %30 = vector.shape_cast %4 : vector<1x256xi1> to vector<1x256xi1>
    %31 = vector.broadcast %30 : vector<1x256xi1> to vector<8x256xi1>
    %32 = vector.broadcast %cst_7 : f32 to vector<8x256xf32>
    %33 = arith.select %31, %29, %32 : vector<8x256xi1>, vector<8x256xf32>
    %34 = arith.subf %28, %33 : vector<8x256xf32>
    %c1_i32_8 = arith.constant 1 : i32
    %35 = tpu.dynamic_rotate %0 by %c1_i32_8 dim 1 : vector<8x256xf32>, i32 -> vector<8x256xf32>
    %cst_9 = arith.constant 0.000000e+00 : f32
    %36 = vector.shape_cast %4 : vector<1x256xi1> to vector<1x256xi1>
    %37 = vector.broadcast %36 : vector<1x256xi1> to vector<8x256xi1>
    %38 = vector.broadcast %cst_9 : f32 to vector<8x256xf32>
    %39 = arith.select %37, %35, %38 : vector<8x256xi1>, vector<8x256xf32>
    %40 = arith.addf %39, %11 : vector<8x256xf32>
    %c255_i32_10 = arith.constant 255 : i32
    %41 = tpu.dynamic_rotate %0 by %c255_i32_10 dim 1 : vector<8x256xf32>, i32 -> vector<8x256xf32>
    %cst_11 = arith.constant 0.000000e+00 : f32
    %42 = vector.shape_cast %6 : vector<1x256xi1> to vector<1x256xi1>
    %43 = vector.broadcast %42 : vector<1x256xi1> to vector<8x256xi1>
    %44 = vector.broadcast %cst_11 : f32 to vector<8x256xf32>
    %45 = arith.select %43, %41, %44 : vector<8x256xi1>, vector<8x256xf32>
    %46 = arith.addf %40, %45 : vector<8x256xf32>
    %c240_i32_12 = arith.constant 240 : i32
    %47 = tpu.dynamic_rotate %46 by %c240_i32_12 dim 1 : vector<8x256xf32>, i32 -> vector<8x256xf32>
    %cst_13 = arith.constant 0.000000e+00 : f32
    %48 = vector.shape_cast %10 : vector<1x256xi1> to vector<1x256xi1>
    %49 = vector.broadcast %48 : vector<1x256xi1> to vector<8x256xi1>
    %50 = vector.broadcast %cst_13 : f32 to vector<8x256xf32>
    %51 = arith.select %49, %47, %50 : vector<8x256xi1>, vector<8x256xf32>
    %c16_i32_14 = arith.constant 16 : i32
    %52 = tpu.dynamic_rotate %46 by %c16_i32_14 dim 1 : vector<8x256xf32>, i32 -> vector<8x256xf32>
    %cst_15 = arith.constant 0.000000e+00 : f32
    %53 = vector.shape_cast %8 : vector<1x256xi1> to vector<1x256xi1>
    %54 = vector.broadcast %53 : vector<1x256xi1> to vector<8x256xi1>
    %55 = vector.broadcast %cst_15 : f32 to vector<8x256xf32>
    %56 = arith.select %54, %52, %55 : vector<8x256xi1>, vector<8x256xf32>
    %57 = arith.subf %51, %56 : vector<8x256xf32>
    %58 = arith.mulf %34, %34 : vector<8x256xf32>
    %59 = arith.mulf %57, %57 : vector<8x256xf32>
    %60 = arith.addf %58, %59 : vector<8x256xf32>
    %61 = math.sqrt %60 : vector<8x256xf32>
    %c0_16 = arith.constant 0 : index
    %c0_17 = arith.constant 0 : index
    %62 = vector.load %arg3[%c0_16, %c0_17] : memref<8x256xf32, #tpu.memory_space<vmem>>, vector<8x256xf32>
    tpu.vector_store %arg3[%c0_16, %c0_17], %61 {strides = array<i32>} : memref<8x256xf32, #tpu.memory_space<vmem>>, vector<8x256xf32>,
    return
  }
  func.func @transform_0(%arg0: i32) -> (i32, i32) {
    %c0_i32 = arith.constant 0 : i32
    %c0_i32_0 = arith.constant 0 : i32
    return %arg0, %c0_i32 : i32, i32
  }
  func.func @transform_1(%arg0: i32) -> (i32, i32) {
    %c0_i32 = arith.constant 0 : i32
    %c0_i32_0 = arith.constant 0 : i32
    %c0_i32_1 = arith.constant 0 : i32
    return %c0_i32, %c0_i32_0 : i32, i32
  }
  func.func @transform_2(%arg0: i32) -> (i32, i32) {
    %c0_i32 = arith.constant 0 : i32
    %c0_i32_0 = arith.constant 0 : i32
    return %arg0, %c0_i32 : i32, i32
  }
}

</mosaic_0001>

<bundles_post_ra>
// kernel: gradient_smooth.1
= control target key start
LH: loop header
LB: loop body
LE: loop exit
PB: predicated region body
PF: predicated region fallthrough
CT: control target
= control target key end

     0   :  { %s170_s11 = smov 1   ;;  %s171_s12 = smov 16   ;;  %v13_v2 = vlaneseq  ;;  %v174_v9 = vmov 0   ;;  %s280_s0 = inlined_call_operand.vmem [shape: f32[8,256], index: 0, kind: input, shape index: {}]   ;;  %s281_s1 = inlined_call_operand.vmem [shape: s32[1,256], index: 1, kind: input, shape index: {}]   ;;  %s282_s2 = inlined_call_operand.vmem [shape: f32[8,256], index: 2, kind: output, shape index: {}]  }
   0x1   :  { %v11_v0 = vld [vmem:[%s280_s0] sm:$0xff]  ;;  %v12_v1 = vld [vmem:[%s280_s0 + $0x8] sm:$0xff]  ;;  %s172_s15 = smov 112   ;;  %s173_s16 = smov 127  }
   0x2   :  { %97 = vrot.lane.b32.xlu1 %v11_v0, %s170_s11  ;;  %25 = vrot.lane.b32.xlu0 %v11_v0, %s171_s12  ;;  %v16_v3 = vld [vmem:[%s281_s1] sm:$0x3]  ;;  %v207_v4 = vand.u32 127, %v13_v2  ;;  %v64_v5 = vshrl.u32 %v13_v2, 7  ;;  %v23_v12 = vadd.f32 %v11_v0, %v11_v0  ;;  %v24_v16 = vadd.f32 %v12_v1, %v12_v1 }
   0x3   :  { %vm17_vm0 = vcmp.gt.s32.totalorder %v16_v3, 0  ;;  %vm18_vm2 = vcmp.lt.s32.totalorder %v16_v3, 15 }
   0x4   :  { %v65_v8 = vsub.s32 0, %v64_v5  ;;  %v82_v10 = vsel %vm17_vm0, 1, %v174_v9  ;;  %vm29_vm1 = vcmp.lt.s32.totalorder %v207_v4, 16  ;;  %v69_v11 = vsub.s32 1, %v64_v5 }
   0x5   :  { %vm19_vm3 = vcmp.ge.s32.totalorder %v207_v4, 16  ;;  %v212_v13 = vadd.s32 128, %v207_v4  ;;  %v62_v18 = vsel %vm18_vm2, 1, %v174_v9  ;;  %vm44_vm4 = vcmp.lt.s32.totalorder %v207_v4, 112 }
   0x6   :  { %99 = vrot.lane.b32.xlu1 %v12_v1, %s170_s11  ;;  %27 = vrot.lane.b32.xlu0 %v12_v1, %s171_s12  ;;  %v86_v19 = vrot.slane %v82_v10, %v65_v8  ;;  %vm79_vm5 = vcmp.lt.s32.totalorder %v207_v4, 1  ;;  %v90_v22 = vrot.slane %v82_v10, %v69_v11  ;;  %vm59_vm7 = vcmp.lt.s32.totalorder %v207_v4, 127 }
   0x7   :  { %vm22_vm6 = vcmp.lt.s32.totalorder %v212_v13, 240  ;;  %v66_v26 = vrot.slane %v62_v18, %v65_v8  ;;  %v70_v30 = vrot.slane %v62_v18, %v69_v11 }
   0x8   :  { %vm91_vm8 = vcmp.eq.s32.totalorder %v86_v19, 1  ;;  %vm92_vm9 = vcmp.eq.s32.totalorder %v90_v22, 1 }
   0x9   :  { %vm71_vm10 = vcmp.eq.s32.totalorder %v66_v26, 1  ;;  %vm72_vm11 = vcmp.eq.s32.totalorder %v70_v30, 1 }
   0xa   :  { %42 = vrot.lane.b32.xlu1 %v12_v1, %s172_s15  ;;  %40 = vrot.lane.b32.xlu0 %v11_v0, %s172_s15 }
   0xe   :  { %109 = vrot.lane.b32.xlu1 %v12_v1, %s173_s16  ;;  %107 = vrot.lane.b32.xlu0 %v11_v0, %s173_s16 }
  0x74   :  { %v98_v6 = vpop.permute.xlu1 %97  ;;  %v26_v7 = vpop.permute.xlu0 %25 }
  0x78   :  { %v100_v14 = vpop.permute.xlu1 %99  ;;  %v28_v15 = vpop.permute.xlu0 %27 }
  0x79   :  { %v31_v17 = vsel %vm29_vm1, %v28_v15, %v26_v7  ;;  %v30_v20 = vsel %vm29_vm1, %v26_v7, %v28_v15  ;;  %v102_v31 = vsel %vm79_vm5, %v100_v14, %v98_v6  ;;  %v101_v34 = vsel %vm79_vm5, %v98_v6, %v100_v14 }
  0x7a   :  { %v36_v21 = vsel %vm19_vm3, %v31_v17, 0.0  ;;  %v39_v27 = vadd.f32 %v30_v20, %v24_v16  ;;  %v103_v38 = vsel %vm91_vm8, %v102_v31, 0.0  ;;  %v104_v41 = vsel %vm92_vm9, %v101_v34, 0.0 }
  0x7b   :  { %v38_v23 = vadd.f32 %v36_v21, %v23_v12  ;;  %v105_v43 = vadd.f32 %v103_v38, %v23_v12  ;;  %v106_v45 = vadd.f32 %v104_v41, %v24_v16 }
  0x7c   :  { %v43_v24 = vpop.permute.xlu1 %42  ;;  %v41_v25 = vpop.permute.xlu0 %40 }
  0x7d   :  { %v45_v28 = vsel %vm44_vm4, %v41_v25, %v43_v24  ;;  %v46_v29 = vsel %vm44_vm4, %v43_v24, %v41_v25 }
  0x7e   :  { %v52_v32 = vsel %vm22_vm6, %v46_v29, 0.0  ;;  %v53_v33 = vadd.f32 %v45_v28, %v38_v23 }
  0x7f   :  { %v54_v35 = vadd.f32 %v52_v32, %v39_v27 }
  0x80   :  { %v110_v36 = vpop.permute.xlu1 %109  ;;  %v108_v37 = vpop.permute.xlu0 %107  ;;  %55 = vrot.lane.b32.xlu0 %v53_v33, %s173_s16 }
  0x81   :  { %v111_v39 = vsel %vm59_vm7, %v108_v37, %v110_v36  ;;  %v112_v40 = vsel %vm59_vm7, %v110_v36, %v108_v37  ;;  %57 = vrot.lane.b32.xlu1 %v54_v35, %s173_s16 }
  0x82   :  { %v113_v42 = vsel %vm71_vm10, %v111_v39, 0.0  ;;  %v114_v44 = vsel %vm72_vm11, %v112_v40, 0.0 }
  0x83   :  { %v115_v46 = vadd.f32 %v113_v42, %v105_v43  ;;  %v116_v47 = vadd.f32 %v114_v44, %v106_v45 }
  0x84   :  { %75 = vrot.lane.b32.xlu0 %v53_v33, %s170_s11 }
  0x85   :  { %77 = vrot.lane.b32.xlu1 %v54_v35, %s170_s11 }
  0x88   :  { %117 = vrot.lane.b32.xlu0 %v115_v46, %s172_s15 }
  0x89   :  { %119 = vrot.lane.b32.xlu1 %v116_v47, %s172_s15 }
  0x8c   :  { %125 = vrot.lane.b32.xlu0 %v115_v46, %s171_s12 }
  0x8d   :  { %127 = vrot.lane.b32.xlu1 %v116_v47, %s171_s12 }
  0xf2   :  { %v56_v48 = vpop.permute.xlu0 %55 }
  0xf3   :  { %v58_v49 = vpop.permute.xlu1 %57 }
  0xf4   :  { %v61_v55 = vsel %vm59_vm7, %v58_v49, %v56_v48  ;;  %v60_v57 = vsel %vm59_vm7, %v56_v48, %v58_v49 }
  0xf5   :  { %v74_v61 = vsel %vm72_vm11, %v61_v55, 0.0  ;;  %v73_v63 = vsel %vm71_vm10, %v60_v57, 0.0 }
  0xf6   :  { %v76_v50 = vpop.permute.xlu0 %75 }
  0xf7   :  { %v78_v51 = vpop.permute.xlu1 %77 }
  0xf8   :  { %v80_v52 = vsel %vm79_vm5, %v76_v50, %v78_v51  ;;  %v81_v53 = vsel %vm79_vm5, %v78_v51, %v76_v50 }
  0xf9   :  { %v94_v58 = vsel %vm92_vm9, %v80_v52, 0.0  ;;  %v93_v59 = vsel %vm91_vm8, %v81_v53, 0.0 }
  0xfa   :  { %v118_v54 = vpop.permute.xlu0 %117  ;;  %v96_v0 = vsub.f32 %v74_v61, %v94_v58  ;;  %v95_v2 = vsub.f32 %v73_v63, %v93_v59 }
  0xfb   :  { %v120_v56 = vpop.permute.xlu1 %119 }
  0xfc   :  { %v122_v60 = vsel %vm44_vm4, %v120_v56, %v118_v54  ;;  %v121_v7 = vsel %vm44_vm4, %v118_v54, %v120_v56  ;;  %v136_v11 = vmul.f32 %v96_v0, %v96_v0  ;;  %v135_v14 = vmul.f32 %v95_v2, %v95_v2 }
  0xfd   :  { %v124_v3 = vsel %vm22_vm6, %v122_v60, 0.0 }
  0xfe   :  { %v126_v62 = vpop.permute.xlu0 %125 }
  0xff   :  { %v128_v1 = vpop.permute.xlu1 %127 }
 0x100   :  { %v129_v5 = vsel %vm29_vm1, %v126_v62, %v128_v1  ;;  %v130_v6 = vsel %vm29_vm1, %v128_v1, %v126_v62 }
 0x101   :  { %v131_v8 = vsel %vm19_vm3, %v130_v6, 0.0  ;;  %v134_v9 = vsub.f32 %v124_v3, %v129_v5 }
 0x102   :  { %v133_v10 = vsub.f32 %v121_v7, %v131_v8 }
 0x103   :  { %v138_v12 = vmul.f32 %v134_v9, %v134_v9 }
 0x104   :  { %v137_v15 = vmul.f32 %v133_v10, %v133_v10 }
 0x105   :  { %v140_v13 = vadd.f32 %v138_v12, %v136_v11 }
 0x106   :  { %v139_v16 = vadd.f32 %v137_v15, %v135_v14 }
 0x107   :  { %166 = vrsqrt.f32 %v140_v13  ;;  %vm150_vm12 = vcmp.eq.f32.partialorder %v140_v13, inf  ;;  %v153_v21 = vand.u32 2147483648, %v140_v13  ;;  %vm152_vm14 = vcmp.eq.f32.partialorder %v140_v13, 0.0 }
 0x108   :  { %168 = vrsqrt.f32 %v139_v16  ;;  %vm143_vm13 = vcmp.eq.f32.partialorder %v139_v16, inf  ;;  %v146_v22 = vand.u32 2147483648, %v139_v16  ;;  %vm145_vm15 = vcmp.eq.f32.partialorder %v139_v16, 0.0 }
 0x114   :  { %v167_v17 = vpop.eup %166 }
 0x115   :  { %v169_v18 = vpop.eup %168  ;;  %v149_v19 = vmul.f32 %v167_v17, %v140_v13 }
 0x116   :  { %v142_v20 = vmul.f32 %v169_v18, %v139_v16 }
 0x117   :  { %v151_v4 = vsel %vm150_vm12, %v140_v13, %v149_v19 }
 0x118   :  { %v144_v23 = vsel %vm143_vm13, %v139_v16, %v142_v20  ;;  %v154_v24 = vsel %vm152_vm14, %v153_v21, %v151_v4 }
 0x119   :  { %v147_v25 = vsel %vm145_vm15, %v146_v22, %v144_v23  ;;  %156 = vst [vmem:[%s282_s2 + $0x8] sm:$0xff] %v154_v24 }
 0x11a   :  { %155 = vst [vmem:[%s282_s2] sm:$0xff] %v147_v25 }

</bundles_post_ra>
